<compile_context>
chip_gen: v7x
topology: tpu7x:2x2x1
jax: 0.10.0
libtpu: 0.0.40
codegen_flags: <defaults>
</compile_context>

<pallas_src>
import jax
import jax.numpy as jnp
from jax.experimental import pallas as pl
from jax.experimental.pallas import tpu as pltpu


# -----------------------------------------------------------------------------
# Pallas kernel: fused mask-modulation + mean-pool (MXU partial sums, f32 acc)
# + dropout(eval)=identity + linear head.
# -----------------------------------------------------------------------------
def _make_pool_fc_kernel(inv_s):
    def kernel(h_ref, m_ref, w_ref, b_ref, o_ref, acc_ref):
        # h_ref: (bt, st, H) bf16/f32   m_ref: (bt, 1, st) f32
        # w_ref: (H, C) f32             b_ref: (1, C) f32
        # o_ref: (bt, C) f32            acc_ref: (bt, 1, H) f32 scratch
        s_idx = pl.program_id(1)

        @pl.when(s_idx == 0)
        def _zero():
            acc_ref[...] = jnp.zeros_like(acc_ref)

        # Fused synthetic-backbone modulation; {0.5, 1.0} are exact in bf16.
        scale = (0.5 + 0.5 * m_ref[...]).astype(h_ref.dtype)     # (bt, 1, st)
        # Batched MXU contraction over the sequence tile, f32 accumulation.
        acc_ref[...] += jnp.einsum("bqs,bsh->bqh", scale, h_ref[...],
                                   preferred_element_type=jnp.float32)

        @pl.when(s_idx == pl.num_programs(1) - 1)
        def _finalize():
            # Accumulate-then-scale: one multiply by 1/S per batch tile.
            pooled = acc_ref[...][:, 0, :] * inv_s                # (bt, H)
            # nn.Dropout(p=0.3) -> identity at inference (eval) time.
            scores = jnp.dot(pooled, w_ref[...],
                             preferred_element_type=jnp.float32)
            o_ref[...] = scores + b_ref[...]

    return kernel


# -----------------------------------------------------------------------------
# Tile selection.
# -----------------------------------------------------------------------------
def _pick_b_tile(B):
    """Divisor of B that is sublane-aligned (multiple of 8, or == B), preferring
    an even batch-tile count >= 2 (so both v7x TensorCores are used) and a
    value near 8."""
    cands = [d for d in range(1, B + 1) if B % d == 0 and (d % 8 == 0 or d == B)]

    def score(d):
        n = B // d
        return (n >= 2, n % 2 == 0, -abs(d - 8))

    return max(cands, key=score)


def _pick_s_tile(S, b_tile, H, elem_bytes, budget_bytes):
    """Largest sequence tile whose h block fits the byte budget.  Valid tiles
    are S itself or divisors of S that are multiples of 128 (lane-dense mask
    block / (8,128) rule)."""
    cands = [S] + [t for t in range(128, S, 128) if S % t == 0]
    fitting = [t for t in cands if b_tile * t * H * elem_bytes <= budget_bytes]
    if fitting:
        return max(fitting)
    return min(cands)   # nothing fits the budget; take the smallest valid tile


# -----------------------------------------------------------------------------
# Wrapper.
# -----------------------------------------------------------------------------
def classifier_forward_fused(hidden, attention_mask, fc_w, fc_b,
                             *, b_tile=None, s_tile=None,
                             h_block_byte_budget=8 << 20,
                             vmem_limit_bytes=48 << 20):
    """hidden: (B, S, H) backbone activations (pre-modulation), attention_mask:
    (B, S) int, fc_w: (H, C) f32, fc_b: (C,) f32 -> (B, C) f32."""
    B, S, H = hidden.shape
    C = fc_w.shape[1]
    elem_bytes = jnp.dtype(hidden.dtype).itemsize

    if b_tile is None:
        b_tile = _pick_b_tile(B)
    if s_tile is None:
        s_tile = _pick_s_tile(S, b_tile, H, elem_bytes, h_block_byte_budget)
    assert B % b_tile == 0 and S % s_tile == 0
    assert b_tile % 8 == 0 or b_tile == B
    assert s_tile % 128 == 0 or s_tile == S

    mask3 = attention_mask.astype(jnp.float32).reshape(B, 1, S)   # lane-dense
    bias2 = fc_b.reshape(1, C)

    grid = (B // b_tile, S // s_tile)   # reduction (seq) axis last

    return pl.pallas_call(
        _make_pool_fc_kernel(1.0 / S),
        out_shape=jax.ShapeDtypeStruct((B, C), jnp.float32),
        grid_spec=pltpu.PrefetchScalarGridSpec(
            num_scalar_prefetch=0,
            grid=grid,
            in_specs=[
                pl.BlockSpec((b_tile, s_tile, H), lambda b, s: (b, s, 0)),
                pl.BlockSpec((b_tile, 1, s_tile), lambda b, s: (b, 0, s)),
                pl.BlockSpec((H, C), lambda b, s: (0, 0)),   # VMEM-resident
                pl.BlockSpec((1, C), lambda b, s: (0, 0)),   # VMEM-resident
            ],
            out_specs=pl.BlockSpec((b_tile, C), lambda b, s: (b, 0)),
            scratch_shapes=[pltpu.VMEM((b_tile, 1, H), jnp.float32)],
        ),
        compiler_params=pltpu.CompilerParams(
            dimension_semantics=("parallel", "arbitrary"),
            vmem_limit_bytes=vmem_limit_bytes),
    )(hidden, mask3, fc_w, bias2)


# -----------------------------------------------------------------------------
# Synthetic stand-in for the pretrained transformer backbone.  It produces the
# raw per-token activations; the attention-mask modulation it used to apply is
# fused into the Pallas kernel (saves one full write + read of (B,S,H)).
# -----------------------------------------------------------------------------
def synthetic_backbone(input_ids, emb_table):
    return emb_table[input_ids].astype(jnp.bfloat16)   # stream h in bf16


if __name__ == "__main__":
    key = jax.random.PRNGKey(0)
    k_emb, k_w, k_b, k_ids, k_mask = jax.random.split(key, 5)

    # Small shapes consistent with the forward pass; big enough to exercise
    # both grid axes: 2 parallel batch tiles x 2 sequence-reduction steps.
    B, S, H, C = 16, 256, 128, 8
    VOCAB = 100

    # Deterministic synthetic parameters (not a checkpoint load).
    emb_table = jax.random.normal(k_emb, (VOCAB, H), dtype=jnp.float32) * 0.02
    fc_w = jax.random.normal(k_w, (H, C), dtype=jnp.float32) * (1.0 / jnp.sqrt(H))
    fc_b = jax.random.normal(k_b, (C,), dtype=jnp.float32) * 0.01

    # Example inputs.
    input_ids = jax.random.randint(k_ids, (B, S), 0, VOCAB, dtype=jnp.int32)
    attention_mask = (jax.random.uniform(k_mask, (B, S)) > 0.2).astype(jnp.int32)

    # Forward: backbone (glue) -> fused Pallas kernel
    # (mask-modulation + mean-pool + dropout(eval) + fc).
    hidden = synthetic_backbone(input_ids, emb_table)

    # Explicit tiling to force a multi-step sequence reduction in the test.
    scores = classifier_forward_fused(hidden, attention_mask, fc_w, fc_b,
                                      b_tile=8, s_tile=128)
    scores = jax.block_until_ready(scores)

    # Pure-JAX reference of the kernel-implemented part (same bf16 input).
    h_f32 = hidden.astype(jnp.float32)
    mod = h_f32 * (0.5 + 0.5 * attention_mask.astype(jnp.float32)[..., None])
    ref = mod.mean(axis=1) @ fc_w + fc_b

    assert scores.shape == (B, C)
    assert jnp.allclose(scores, ref, atol=1e-4, rtol=1e-4)

    # Auto-tiled path: byte-budgeted s_tile collapses the reduction to 1 step.
    scores_auto = jax.block_until_ready(
        classifier_forward_fused(hidden, attention_mask, fc_w, fc_b))
    assert jnp.allclose(scores_auto, ref, atol=1e-4, rtol=1e-4)

    print("KERNEL_OK")
</pallas_src>

<mosaic_0001>
module attributes {stable_mosaic.version = 11 : i64} {
  func.func @kernel(%arg0: i32, %arg1: i32, %arg2: memref<8x128x128xbf16, #tpu.memory_space<vmem>>, %arg3: memref<8x1x128xf32, #tpu.memory_space<vmem>>, %arg4: memref<128x8xf32, #tpu.memory_space<vmem>>, %arg5: memref<1x8xf32, #tpu.memory_space<vmem>>, %arg6: memref<8x8xf32, #tpu.memory_space<vmem>>, %arg7: memref<8x1x128xf32, #tpu.memory_space<vmem>>) attributes {dimension_semantics = [#tpu.dimension_semantics<parallel>, #tpu.dimension_semantics<arbitrary>], iteration_bounds = array<i64: 2, 2>, scalar_prefetch = 0 : i64, scratch_operands = 1 : i64, tpu.core_type = #tpu.core_type<tc>, window_params = [{transform_indices = @transform_0, window_bounds = array<i64: 8, 128, 128>}, {transform_indices = @transform_1, window_bounds = array<i64: 8, 1, 128>}, {pipeline_mode = #tpu.pipeline_mode<synchronous>, transform_indices = @transform_2, window_bounds = array<i64: 128, 8>}, {pipeline_mode = #tpu.pipeline_mode<synchronous>, transform_indices = @transform_3, window_bounds = array<i64: 1, 8>}, {transform_indices = @transform_4, window_bounds = array<i64: 8, 8>}]} {
    %c0_i32 = arith.constant 0 : i32
    %0 = arith.cmpi eq, %arg1, %c0_i32 : i32
    %1 = arith.extui %0 : i1 to i32
    %c0_i32_0 = arith.constant 0 : i32
    %2 = arith.cmpi ne, %1, %c0_i32_0 : i32
    scf.if %2 {
      %cst_15 = arith.constant 0.000000e+00 : f32
      %17 = vector.broadcast %cst_15 : f32 to vector<8x1x128xf32>
      %c0_16 = arith.constant 0 : index
      %c0_17 = arith.constant 0 : index
      %c0_18 = arith.constant 0 : index
      %18 = vector.load %arg7[%c0_16, %c0_17, %c0_18] : memref<8x1x128xf32, #tpu.memory_space<vmem>>, vector<8x1x128xf32>
      tpu.vector_store %arg7[%c0_16, %c0_17, %c0_18], %17 {strides = array<i32>} : memref<8x1x128xf32, #tpu.memory_space<vmem>>, vector<8x1x128xf32>,
    } else {
    }
    %c0 = arith.constant 0 : index
    %c0_1 = arith.constant 0 : index
    %c0_2 = arith.constant 0 : index
    %3 = vector.load %arg3[%c0, %c0_1, %c0_2] : memref<8x1x128xf32, #tpu.memory_space<vmem>>, vector<8x1x128xf32>
    %cst = arith.constant 5.000000e-01 : f32
    %4 = vector.broadcast %cst : f32 to vector<8x1x128xf32>
    %5 = arith.mulf %4, %3 : vector<8x1x128xf32>
    %cst_3 = arith.constant 5.000000e-01 : f32
    %6 = vector.broadcast %cst_3 : f32 to vector<8x1x128xf32>
    %7 = arith.addf %6, %5 : vector<8x1x128xf32>
    %8 = arith.truncf %7 : vector<8x1x128xf32> to vector<8x1x128xbf16>
    %c0_4 = arith.constant 0 : index
    %c0_5 = arith.constant 0 : index
    %c0_6 = arith.constant 0 : index
    %9 = vector.load %arg7[%c0_4, %c0_5, %c0_6] : memref<8x1x128xf32, #tpu.memory_space<vmem>>, vector<8x1x128xf32>
    %c0_7 = arith.constant 0 : index
    %c0_8 = arith.constant 0 : index
    %c0_9 = arith.constant 0 : index
    %10 = vector.load %arg2[%c0_7, %c0_8, %c0_9] : memref<8x128x128xbf16, #tpu.memory_space<vmem>>, vector<8x128x128xbf16>
    "tpu.trace_start"() <{level = 10 : i32, message = "bqs,bsh->bqh"}> : () -> ()
    %cst_10 = arith.constant dense<0.000000e+00> : vector<8x1x128xf32>
    %11 = tpu.matmul %8, %10, %cst_10 {dimension_numbers = #tpu.dot_dimension_numbers<[2], [1], [1], [2], [0, 0, 0, 1, 1, 2], [0], [0]>} : vector<8x1x128xbf16>, vector<8x128x128xbf16>, vector<8x1x128xf32> -> vector<8x1x128xf32>
    "tpu.trace_stop"() : () -> ()
    %12 = arith.addf %9, %11 : vector<8x1x128xf32>
    %c0_11 = arith.constant 0 : index
    %c0_12 = arith.constant 0 : index
    %c0_13 = arith.constant 0 : index
    %13 = vector.load %arg7[%c0_11, %c0_12, %c0_13] : memref<8x1x128xf32, #tpu.memory_space<vmem>>, vector<8x1x128xf32>
    tpu.vector_store %arg7[%c0_11, %c0_12, %c0_13], %12 {strides = array<i32>} : memref<8x1x128xf32, #tpu.memory_space<vmem>>, vector<8x1x128xf32>,
    %c1_i32 = arith.constant 1 : i32
    %14 = arith.cmpi eq, %arg1, %c1_i32 : i32
    %15 = arith.extui %14 : i1 to i32
    %c0_i32_14 = arith.constant 0 : i32
    %16 = arith.cmpi ne, %15, %c0_i32_14 : i32
    scf.if %16 {
      %c0_15 = arith.constant 0 : index
      %c0_16 = arith.constant 0 : index
      %c0_17 = arith.constant 0 : index
      %17 = vector.load %arg7[%c0_15, %c0_16, %c0_17] : memref<8x1x128xf32, #tpu.memory_space<vmem>>, vector<8x1x128xf32>
      %18 = vector.shape_cast %17 : vector<8x1x128xf32> to vector<8x128xf32>
      %cst_18 = arith.constant 3.906250e-03 : f32
      %19 = vector.broadcast %cst_18 : f32 to vector<8x128xf32>
      %20 = arith.mulf %18, %19 : vector<8x128xf32>
      %c0_19 = arith.constant 0 : index
      %c0_20 = arith.constant 0 : index
      %21 = vector.load %arg4[%c0_19, %c0_20] : memref<128x8xf32, #tpu.memory_space<vmem>>, vector<128x8xf32>
      %cst_21 = arith.constant dense<0.000000e+00> : vector<8x8xf32>
      %22 = tpu.matmul %20, %21, %cst_21 {dimension_numbers = #tpu.dot_dimension_numbers<[1], [0], [0], [1], [0, 0, 1, 1], [], []>} : vector<8x128xf32>, vector<128x8xf32>, vector<8x8xf32> -> vector<8x8xf32>
      %c0_22 = arith.constant 0 : index
      %c0_23 = arith.constant 0 : index
      %23 = vector.load %arg5[%c0_22, %c0_23] : memref<1x8xf32, #tpu.memory_space<vmem>>, vector<1x8xf32>
      %24 = vector.broadcast %23 : vector<1x8xf32> to vector<8x8xf32>
      %25 = arith.addf %22, %24 : vector<8x8xf32>
      %c0_24 = arith.constant 0 : index
      %c0_25 = arith.constant 0 : index
      %26 = vector.load %arg6[%c0_24, %c0_25] : memref<8x8xf32, #tpu.memory_space<vmem>>, vector<8x8xf32>
      tpu.vector_store %arg6[%c0_24, %c0_25], %25 {strides = array<i32>} : memref<8x8xf32, #tpu.memory_space<vmem>>, vector<8x8xf32>,
    } else {
    }
    return
  }
  func.func @transform_0(%arg0: i32, %arg1: i32) -> (i32, i32, i32) {
    %c0_i32 = arith.constant 0 : i32
    %c0_i32_0 = arith.constant 0 : i32
    return %arg0, %arg1, %c0_i32 : i32, i32, i32
  }
  func.func @transform_1(%arg0: i32, %arg1: i32) -> (i32, i32, i32) {
    %c0_i32 = arith.constant 0 : i32
    %c0_i32_0 = arith.constant 0 : i32
    return %arg0, %c0_i32, %arg1 : i32, i32, i32
  }
  func.func @transform_2(%arg0: i32, %arg1: i32) -> (i32, i32) {
    %c0_i32 = arith.constant 0 : i32
    %c0_i32_0 = arith.constant 0 : i32
    %c0_i32_1 = arith.constant 0 : i32
    return %c0_i32, %c0_i32_0 : i32, i32
  }
  func.func @transform_3(%arg0: i32, %arg1: i32) -> (i32, i32) {
    %c0_i32 = arith.constant 0 : i32
    %c0_i32_0 = arith.constant 0 : i32
    %c0_i32_1 = arith.constant 0 : i32
    return %c0_i32, %c0_i32_0 : i32, i32
  }
  func.func @transform_4(%arg0: i32, %arg1: i32) -> (i32, i32) {
    %c0_i32 = arith.constant 0 : i32
    %c0_i32_0 = arith.constant 0 : i32
    return %arg0, %c0_i32 : i32, i32
  }
}

</mosaic_0001>

<bundles_post_ra>
// kernel: tpu_custom_call.1
= control target key start
LH: loop header
LB: loop body
LE: loop exit
PB: predicated region body
PF: predicated region fallthrough
CT: control target
= control target key end

     0   :  { %s2536_s0 = inlined_call_operand.hbm [shape: bf16[16,256,128], index: 0, kind: input, shape index: {}]   ;;  %s2537_s1 = inlined_call_operand.vmem [shape: f32[16,1,256], index: 1, kind: input, shape index: {}]   ;;  %s2538_s2 = inlined_call_operand.vmem [shape: f32[128,8], index: 2, kind: input, shape index: {}]   ;;  %s2539_s3 = inlined_call_operand.vmem [shape: f32[1,8], index: 3, kind: input, shape index: {}]   ;;  %s2540_s4 = inlined_call_operand.vmem [shape: f32[16,8], index: 4, kind: output, shape index: {}]  }
   0x1   :  { %2541 = sst [smem:[#allocation10_spill]] %s2536_s0 }
   0x2   :  { %9 = vsyncpa [#allocation4], 0 }
   0x3   :  { %11 = vsyncpa [#allocation4 + $0x1], 0  ;;  %s2179_s15 = smov 0   ;;  %s2181_s16 = smov 0  }
   0x4   :  { %s2183_s17 = smov 0   ;;  %s2185_s18 = smov 0  }
   0x5   :  { %s2187_s19 = smov 0   ;;  %s2189_s20 = smov 0  }
   0x6   :  { %s2191_s21 = smov 0   ;;  %s2193_s22 = smov 0  }
   0x7 LB: > { %s26_s23 = sadd.s32 1, %s2131_s20  ;;  %s29_s24 = sadd.s32 1, %s2135_s21  ;;  %s2139_s22 = sphi %s2193_s22, %s17_s22   ;;  %s2135_s21 = sphi %s2191_s21, %s2551_s21   ;;  %s2131_s20 = sphi %s2189_s20, %s2550_s20   ;;  %s2127_s19 = sphi %s2187_s19, %s2549_s19   ;;  %s2123_s18 = sphi %s2185_s18, %s2548_s18   ;;  %s2119_s17 = sphi %s2183_s17, %s2547_s17   ;;  %s2115_s16 = sphi %s2181_s16, %s2546_s16   ;;  %s2111_s15 = sphi %s2179_s15, %s2545_s15  }
   0x8   : > { %p27_p0 = scmp.ge.s32.totalorder %s26_s23, 2  ;;  %s1526_s25 = sadd.s32 4294967295, %s2139_s22  }
   0x9   : > { %p45_p1 = scmp.ne.s32.totalorder %s2119_s17, %s2115_s16  ;;  %p46_p2 = scmp.eq.s32.totalorder %s2139_s22, 0 }
   0xa   : > { %s2553_s23 = smov (%p27_p0, %s26_s23), 0  ;;  %s2555_s24 = smov (!%p27_p0, %s29_s24), %s2135_s21 }
   0xb   : > { %s34_s26 = ssub.s32 %s2131_s20, %s2553_s23  ;;  %p31_p3 = scmp.ge.s32.totalorder %s2555_s24, 2 }
   0xc   : > { %p51_p4 = scmp.ne.s32.totalorder %s2115_s16, %s2111_s15  ;;  %p2229_p5 = por %p46_p2, %p45_p1 }
   0xd   : > { %p52_p6 = scmp.eq.s32.totalorder %s1526_s25, 0  ;;  %s2557_s24 = smov (%p31_p3, %s2555_s24), 0 }
   0xe   : > { %s33_s29 = ssub.s32 %s2135_s21, %s2557_s24  ;;  %s38_s5 = sadd.s32 1, %s2119_s17 }
   0xf   : > { %p2235_p7 = por %p52_p6, %p51_p4  ;;  %s35_s30 = sor.u32 %s34_s26, %s33_s29 }
  0x10   : > { %p36_p8 = scmp.eq.s32.totalorder %s35_s30, 0  ;;  %p1529_p9 = scmp.ge.s32.totalorder %s2139_s22, 4 }
  0x12   : > { %s2243_s6 = scalar_select %p36_p8, %s2119_s17, %s38_s5  }
  0x13   : > { %173 = sbr.rel (%p1529_p9) target bundleno = 51 (0x33), region = 24 }
  0x1a   : > { %s2247_s7 = sand.u32 1, %s2119_s17   ;;  %s1532_s8 = sshll.u32 %s2131_s20, 4 }
  0x1b   : > { %s1530_s9 = sshll.u32 %s2247_s7, 9  ;;  %s1613_s10 = sshll.u32 %s2135_s21, 8 }
  0x1c   : > { %s188_s11 = sadd.s32 %s1613_s10, %s1532_s8  ;;  %s181_s12 = scalar_lea.vmem [#allocation3], %s1530_s9 }
  0x1d   : > { %s203_s13 = sshll.u32 %s181_s12, 4  ;;  %s1534_s14 = sshll.u32 %s188_s11, 6  ;;  %s204_s13 = int_to_ptr.vmem [resolvable:$true] %s203_s13 }
  0x1e   : > { %s1923_s15 = scalar_select %p2229_p5, [#allocation0], [#allocation8] }
  0x1f   : > { %s2141_s25 = smov 2048   ;;  %s2142_s29 = smov 1024  }
  0x20   : > { %1924 = sst [smem:[#allocation7]] (%p2229_p5), %s2141_s25  ;;  %s2143_s30 = smov 16  }
  0x21   : > { %s195_s26 = sld [smem:[%s1923_s15]]   ;;  %s2144_s5 = smov 64  }
  0x22   : > { %1925 = sst [smem:[#allocation7 + $0x1]] (%p2229_p5), %s2142_s29  ;;  %s2544_s0 = sld [smem:[#allocation10_spill]] }
  0x23   : > { %1926 = sst [smem:[#allocation7 + $0x2]] (%p2229_p5), %s2143_s30  ;;  %s2145_s11 = smov 4  }
  0x24   : > { %1927 = sst [smem:[#allocation7 + $0x3]] (%p2229_p5), %s2144_s5  ;;  %s178_s25 = scalar_lea.sflag [#allocation4], %s2247_s7 }
  0x25   : > { %1928 = sst [smem:[#allocation7 + $0x4]] (%p2229_p5), %s2144_s5  ;;  %s2146_s29 = smov [#allocation6]  }
  0x26   : > { %1929 = sst [smem:[#allocation7 + $0x5]] (%p2229_p5), %s2145_s11  ;;  %225 = sbr.rel (!%p2229_p5) target bundleno = 51 (0x33), region = 32 }
  0x27   : > { %s1535_s12 = sshll.u32 %s195_s26, 26  ;;  %s1537_s30 = sshll.u32 (%p2229_p5), %s2247_s7, 3 }
  0x28   : > { %s190_s10 = scalar_lea.hbm %s2544_s0, %s1534_s14  ;;  %s1536_s15 = sadd.s32 134217728, %s1535_s12 }
  0x29   : > { %1930 = dma.general (%p2229_p5), %s190_s10, 8192, %s204_s13, %s178_s25, %s2146_s29, [#allocation7], %s1536_s15, 0  }
  0x2a   : > { %s1614_s8 = sshll.u32 (%p2229_p5), %s2135_s21, 4  ;;  %s229_s26 = scalar_lea.vmem (%p2229_p5), [#allocation5], %s1537_s30 }
  0x2b   : > { %s232_s14 = sadd.s32 (%p2229_p5), %s2131_s20, %s1614_s8 }
  0x2c   : > { %s233_s0 = scalar_lea.vmem (%p2229_p5), %s2537_s1, %s232_s14 }
  0x2d   : > { %v249_v0 = vld [vmem:[%s233_s0] sm:$0x1]  ;;  %v251_v1 = vld [vmem:[%s233_s0 + $0x2] sm:$0x1]  ;;  %v253_v2 = vld [vmem:[%s233_s0 + $0x4] sm:$0x1] }
  0x2e   : > { %250 = vst [vmem:[%s229_s26] sm:$0x1] %v249_v0  ;;  %252 = vst [vmem:[%s229_s26 + $0x1] sm:$0x1] %v251_v1  ;;  %v255_v3 = vld [vmem:[%s233_s0 + $0x6] sm:$0x1] }
  0x2f   : > { %254 = vst [vmem:[%s229_s26 + $0x2] sm:$0x1] %v253_v2  ;;  %v257_v4 = vld [vmem:[%s233_s0 + $0x8] sm:$0x1]  ;;  %v259_v5 = vld [vmem:[%s233_s0 + $0xa] sm:$0x1] }
  0x30   : > { %256 = vst [vmem:[%s229_s26 + $0x3] sm:$0x1] %v255_v3  ;;  %258 = vst [vmem:[%s229_s26 + $0x4] sm:$0x1] %v257_v4  ;;  %v261_v6 = vld [vmem:[%s233_s0 + $0xc] sm:$0x1] }
  0x31   : > { %260 = vst [vmem:[%s229_s26 + $0x5] sm:$0x1] %v259_v5  ;;  %v263_v7 = vld [vmem:[%s233_s0 + $0xe] sm:$0x1]  ;;  %262 = vst [vmem:[%s229_s26 + $0x6] sm:$0x1] %v261_v6 }
  0x32   : > { %264 = vst [vmem:[%s229_s26 + $0x7] sm:$0x1] %v263_v7 }
  0x33 PF: > { %p1540_p10 = scmp.ge.s32.totalorder %s2139_s22, 1  ;;  %p302_p11 = scmp.lt.s32.totalorder %s2139_s22, 5 }
  0x35   : > { %p303_p12 = pnand %p1540_p10, %p302_p11 }
  0x36   : > { %s308_s27 = sand.u32 (!%p303_p12), 1, %s2115_s16  }
  0x37   : > { %306 = sbr.rel (%p303_p12) target bundleno = 652 (0x28c), region = 73  ;;  %s1541_s7 = sshll.u32 (!%p303_p12), %s308_s27, 9 }
  0x38   : > { %s309_s13 = scalar_lea.sflag (!%p303_p12), [#allocation4], %s308_s27  ;;  %s2283_s10 = scalar_lea.vmem (!%p303_p12), [#allocation3], %s1541_s7 }
  0x3e   : > { %2106 = dma.done.wait (%p2235_p7), %s309_s13, 8192  }
  0x3f   : > { %2108 = vsyncadd (%p2235_p7), %s309_s13, 4294959104  ;;  %s1542_s0 = sshll.u32 %s308_s27, 3  ;;  %p350_p13 = scmp.lt.s32.totalorder %s2127_s19, 1 }
  0x40   : > { %s2296_s29 = scalar_lea.vmem [#allocation5], %s1542_s0  ;;  %p1544_p0 = scmp.ne.s32.totalorder %s2123_s18, 0 }
  0x41   : > { %s2559_s19 = smov (!%p350_p13, %s2127_s19), 1  ;;  %v2147_v8 = vmov (!%p1544_p0), 0.0  }
  0x42   : > { %s1543_s11 = sshll.u32 %s2559_s19, 3  ;;  %358 = sbr.rel (%p1544_p0) target bundleno = 73 (0x49), region = 85  ;;  %359 = vst [vmem:[#allocation2] sm:$0x1] (!%p1544_p0), %v2147_v8  ;;  %360 = vst [vmem:[#allocation2 + $0x1] sm:$0x1] (!%p1544_p0), %v2147_v8 }
  0x43   : > { %s2294_s25 = scalar_lea.vmem %s2540_s4, %s1543_s11  ;;  %361 = vst [vmem:[#allocation2 + $0x2] sm:$0x1] (!%p1544_p0), %v2147_v8  ;;  %362 = vst [vmem:[#allocation2 + $0x3] sm:$0x1] (!%p1544_p0), %v2147_v8 }
  0x44   : > { %363 = vst [vmem:[#allocation2 + $0x4] sm:$0x1] (!%p1544_p0), %v2147_v8  ;;  %364 = vst [vmem:[#allocation2 + $0x5] sm:$0x1] (!%p1544_p0), %v2147_v8 }
  0x45   : > { %365 = vst [vmem:[#allocation2 + $0x6] sm:$0x1] (!%p1544_p0), %v2147_v8  ;;  %366 = vst [vmem:[#allocation2 + $0x7] sm:$0x1] (!%p1544_p0), %v2147_v8 }
  0x49 PF: > { %v2009_v9 = vld [vmem:[%s2283_s10] sm:$0xff]   ;;  %v2148_v10 = vmov 0.0   ;;  %v2011_v12 = vld [vmem:[%s2283_s10 + $0x8] sm:$0xff]   ;;  %vm2149_vm0 = vmmov 0   ;;  %v2013_v14 = vld [vmem:[%s2283_s10 + $0x10] sm:$0xff]   ;;  %p1609_p1 = scmp.ne.s32.totalorder %s2123_s18, 1 }
  0x4a   : > { %1704 = vmatprep.subr.bf16.mxu0 %v2148_v10  ;;  %1724 = vmatprep.subr.bf16.mxu1 %v2148_v10  ;;  %v2010_v11 = vld [vmem:[%s2283_s10 + $0x40] sm:$0xff]   ;;  %v2012_v13 = vld [vmem:[%s2283_s10 + $0x48] sm:$0xff]   ;;  %v2014_v15 = vld [vmem:[%s2283_s10 + $0x50] sm:$0xff]   ;;  %vm2151_vm1 = vmmov (!%p1609_p1), 0   ;;  %vm1426_vm2 = vcmask (!%p1609_p1), 64512  }
  0x4b   : > { %1705 = vmatpush3.bf16.msra.mxu0 %v2009_v9  ;;  %1720 = vmatprep.mubr.msk.bf16.mxu0 %vm2149_vm0, %v2148_v10  ;;  %v2015_v16 = vld [vmem:[%s2283_s10 + $0x18] sm:$0xff]   ;;  %v2017_v18 = vld [vmem:[%s2283_s10 + $0x20] sm:$0xff]   ;;  %v2019_v20 = vld [vmem:[%s2283_s10 + $0x28] sm:$0xff]  }
  0x4c   : > { %1725 = vmatpush3.bf16.msra.mxu1 %v2010_v11  ;;  %1706 = vmatprep.subr.bf16.mxu0 %v2148_v10  ;;  %v2016_v17 = vld [vmem:[%s2283_s10 + $0x58] sm:$0xff]   ;;  %v2018_v19 = vld [vmem:[%s2283_s10 + $0x60] sm:$0xff]   ;;  %v2020_v22 = vld [vmem:[%s2283_s10 + $0x68] sm:$0xff]  }
  0x4d   : > { %1726 = vmatprep.subr.bf16.mxu1 %v2148_v10  ;;  %1740 = vmatprep.mubr.msk.bf16.mxu1 %vm2149_vm0, %v2148_v10  ;;  %v367_v21 = vld [vmem:[%s2296_s29] sm:$0x1]  ;;  %v368_v23 = vld [vmem:[%s2296_s29 + $0x1] sm:$0x1]  ;;  %v2021_v25 = vld [vmem:[%s2283_s10 + $0x30] sm:$0xff]  }
  0x4e   : > { %v375_v24 = vmul.f32 0.5, %v367_v21  ;;  %v376_v26 = vmul.f32 0.5, %v368_v23  ;;  %v2022_v27 = vld [vmem:[%s2283_s10 + $0x70] sm:$0xff]   ;;  %v2023_v29 = vld [vmem:[%s2283_s10 + $0x38] sm:$0xff]   ;;  %v2025_v34 = vld [vmem:[%s2283_s10 + $0x80] sm:$0xff]  }
  0x4f   : > { %1707 = vmatpush3.bf16.msra.mxu0 %v2011_v12  ;;  %v2024_v31 = vld [vmem:[%s2283_s10 + $0x78] sm:$0xff]   ;;  %v2026_v35 = vld [vmem:[%s2283_s10 + $0xc0] sm:$0xff]   ;;  %v2027_v36 = vld [vmem:[%s2283_s10 + $0x88] sm:$0xff]  }
  0x50   : > { %1727 = vmatpush3.bf16.msra.mxu1 %v2012_v13  ;;  %1708 = vmatprep.subr.bf16.mxu0 %v2148_v10  ;;  %v383_v28 = vadd.f32 0.5, %v375_v24  ;;  %v384_v30 = vadd.f32 0.5, %v376_v26  ;;  %v2028_v37 = vld [vmem:[%s2283_s10 + $0xc8] sm:$0xff]   ;;  %v2029_v38 = vld [vmem:[%s2283_s10 + $0x90] sm:$0xff]   ;;  %v2031_v40 = vld [vmem:[%s2283_s10 + $0x98] sm:$0xff]  }
  0x51   : > { %1728 = vmatprep.subr.bf16.mxu1 %v2148_v10  ;;  %v2030_v39 = vld [vmem:[%s2283_s10 + $0xd0] sm:$0xff]   ;;  %v2032_v41 = vld [vmem:[%s2283_s10 + $0xd8] sm:$0xff]   ;;  %v2033_v42 = vld [vmem:[%s2283_s10 + $0xa0] sm:$0xff]  }
  0x52   : > { %v391_v32 = vpack.c.bf16 %v383_v28, %v383_v28  ;;  %v392_v33 = vpack.c.bf16 %v384_v30, %v384_v30  ;;  %v2034_v43 = vld [vmem:[%s2283_s10 + $0xe0] sm:$0xff]   ;;  %v2035_v44 = vld [vmem:[%s2283_s10 + $0xa8] sm:$0xff]   ;;  %v2037_v49 = vld [vmem:[%s2283_s10 + $0xb0] sm:$0xff]  }
  0x53   : > { %1709 = vmatpush3.bf16.msra.mxu0 %v2013_v14  ;;  %v369_v45 = vld [vmem:[%s2296_s29 + $0x2] sm:$0x1]  ;;  %v370_v47 = vld [vmem:[%s2296_s29 + $0x3] sm:$0x1]  ;;  %v2038_v51 = vld [vmem:[%s2283_s10 + $0xf0] sm:$0xff]  }
  0x54   : > { %1729 = vmatpush3.bf16.msra.mxu1 %v2014_v15  ;;  %1710 = vmatprep.subr.bf16.mxu0 %v2148_v10  ;;  %v2036_v46 = vld [vmem:[%s2283_s10 + $0xe8] sm:$0xff]   ;;  %v377_v48 = vmul.f32 0.5, %v369_v45  ;;  %v378_v50 = vmul.f32 0.5, %v370_v47  ;;  %v2039_v53 = vld [vmem:[%s2283_s10 + $0xb8] sm:$0xff]   ;;  %v2041_v58 = vld [vmem:[%s2283_s10 + $0x100] sm:$0xff]  }
  0x55   : > { %1730 = vmatprep.subr.bf16.mxu1 %v2148_v10  ;;  %v2040_v55 = vld [vmem:[%s2283_s10 + $0xf8] sm:$0xff]   ;;  %v2042_v59 = vld [vmem:[%s2283_s10 + $0x140] sm:$0xff]   ;;  %v2043_v60 = vld [vmem:[%s2283_s10 + $0x108] sm:$0xff]  }
  0x56   : > { %v385_v52 = vadd.f32 0.5, %v377_v48  ;;  %v386_v54 = vadd.f32 0.5, %v378_v50  ;;  %v2044_v61 = vld [vmem:[%s2283_s10 + $0x148] sm:$0xff]   ;;  %v2045_v62 = vld [vmem:[%s2283_s10 + $0x110] sm:$0xff]   ;;  %v2047_v0 = vld [vmem:[%s2283_s10 + $0x118] sm:$0xff]  }
  0x57   : > { %1711 = vmatpush3.bf16.msra.mxu0 %v2015_v16  ;;  %v2046_v63 = vld [vmem:[%s2283_s10 + $0x150] sm:$0xff]   ;;  %v2048_v1 = vld [vmem:[%s2283_s10 + $0x158] sm:$0xff]   ;;  %v2049_v2 = vld [vmem:[%s2283_s10 + $0x120] sm:$0xff]  }
  0x58   : > { %1731 = vmatpush3.bf16.msra.mxu1 %v2016_v17  ;;  %1712 = vmatprep.subr.bf16.mxu0 %v2148_v10  ;;  %v393_v56 = vpack.c.bf16 %v385_v52, %v385_v52  ;;  %v394_v57 = vpack.c.bf16 %v386_v54, %v386_v54  ;;  %v2050_v3 = vld [vmem:[%s2283_s10 + $0x160] sm:$0xff]   ;;  %v2051_v4 = vld [vmem:[%s2283_s10 + $0x128] sm:$0xff]   ;;  %v2053_v9 = vld [vmem:[%s2283_s10 + $0x130] sm:$0xff]  }
  0x59   : > { %1732 = vmatprep.subr.bf16.mxu1 %v2148_v10  ;;  %v371_v5 = vld [vmem:[%s2296_s29 + $0x4] sm:$0x1]  ;;  %v372_v7 = vld [vmem:[%s2296_s29 + $0x5] sm:$0x1]  ;;  %v2054_v12 = vld [vmem:[%s2283_s10 + $0x170] sm:$0xff]  }
  0x5a   : > { %v2052_v6 = vld [vmem:[%s2283_s10 + $0x168] sm:$0xff]   ;;  %v379_v8 = vmul.f32 0.5, %v371_v5  ;;  %v380_v11 = vmul.f32 0.5, %v372_v7  ;;  %v2055_v14 = vld [vmem:[%s2283_s10 + $0x138] sm:$0xff]   ;;  %v2061_v23 = vld [vmem:[%s2283_s10 + $0x190] sm:$0xff]  }
  0x5b   : > { %1713 = vmatpush3.bf16.msra.mxu0 %v2017_v18  ;;  %v2056_v16 = vld [vmem:[%s2283_s10 + $0x178] sm:$0xff]   ;;  %v2059_v21 = vld [vmem:[%s2283_s10 + $0x188] sm:$0xff]   ;;  %v2062_v24 = vld [vmem:[%s2283_s10 + $0x1d0] sm:$0xff]  }
  0x5c   : > { %1733 = vmatpush3.bf16.msra.mxu1 %v2018_v19  ;;  %1714 = vmatprep.subr.bf16.mxu0 %v2148_v10  ;;  %v387_v13 = vadd.f32 0.5, %v379_v8  ;;  %v388_v15 = vadd.f32 0.5, %v380_v11  ;;  %v2057_v19 = vld [vmem:[%s2283_s10 + $0x180] sm:$0xff]   ;;  %v2064_v26 = vld [vmem:[%s2283_s10 + $0x1d8] sm:$0xff]  }
  0x5d   : > { %1734 = vmatprep.subr.bf16.mxu1 %v2148_v10  ;;  %v2066_v28 = vld [vmem:[%s2283_s10 + $0x1e0] sm:$0xff]   ;;  %v401_v54 = vld [vmem:[#allocation2 + $0x2] sm:$0x1] }
  0x5e   : > { %v395_v17 = vpack.c.bf16 %v387_v13, %v387_v13  ;;  %v396_v18 = vpack.c.bf16 %v388_v15, %v388_v15  ;;  %v373_v30 = vld [vmem:[%s2296_s29 + $0x6] sm:$0x1]  ;;  %v405_v15 = vld [vmem:[#allocation2 + $0x6] sm:$0x1] }
  0x5f   : > { %1715 = vmatpush3.bf16.msra.mxu0 %v2019_v20  ;;  %v2058_v20 = vld [vmem:[%s2283_s10 + $0x1c0] sm:$0xff]  }
  0x60   : > { %1735 = vmatpush3.bf16.msra.mxu1 %v2020_v22  ;;  %1716 = vmatprep.subr.bf16.mxu0 %v2148_v10  ;;  %v2060_v22 = vld [vmem:[%s2283_s10 + $0x1c8] sm:$0xff]  }
  0x61   : > { %1736 = vmatprep.subr.bf16.mxu1 %v2148_v10 }
  0x63   : > { %1717 = vmatpush3.bf16.msra.mxu0 %v2021_v25  ;;  %v2063_v25 = vld [vmem:[%s2283_s10 + $0x198] sm:$0xff]  }
  0x64   : > { %1737 = vmatpush3.bf16.msra.mxu1 %v2022_v27  ;;  %1718 = vmatprep.subr.bf16.mxu0 %v2148_v10  ;;  %v2065_v27 = vld [vmem:[%s2283_s10 + $0x1a0] sm:$0xff]  }
  0x65   : > { %1738 = vmatprep.subr.bf16.mxu1 %v2148_v10 }
  0x67   : > { %1719 = vmatpush3.bf16.msra.mxu0 %v2023_v29  ;;  %v2067_v29 = vld [vmem:[%s2283_s10 + $0x1a8] sm:$0xff]  }
  0x68   : > { %1739 = vmatpush3.bf16.msra.mxu1 %v2024_v31  ;;  %1744 = vmatprep.subr.bf16.mxu0 %v2148_v10  ;;  %v2068_v31 = vld [vmem:[%s2283_s10 + $0x1e8] sm:$0xff]  }
  0x69   : > { %1764 = vmatprep.subr.bf16.mxu1 %v2148_v10 }
  0x6a   : > { %1721 = vmatmul.mubr.bf16.vlgmr.msra.gmra.mrb[0].mxu0 %v391_v32  ;;  %v374_v32 = vld [vmem:[%s2296_s29 + $0x7] sm:$0x1] }
  0x6b   : > { %1741 = vmatmul.mubr.bf16.vlgmr.msra.gmra.mrb[0].mxu1 %v392_v33  ;;  %1745 = vmatpush3.bf16.msra.mxu0 %v2025_v34  ;;  %v381_v33 = vmul.f32 0.5, %v373_v30  ;;  %v2069_v34 = vld [vmem:[%s2283_s10 + $0x1b0] sm:$0xff]   ;;  %v2150_v30 = vmov (!%p1609_p1), 0.0|0.0  }
  0x6c   : > { %1765 = vmatpush3.bf16.msra.mxu1 %v2026_v35  ;;  %1746 = vmatprep.subr.bf16.mxu0 %v2148_v10  ;;  %v382_v35 = vmul.f32 0.5, %v374_v32  ;;  %v1278_v32 = vld [vmem:[%s2538_s2 + $0x18] sm:$0xff] (!%p1609_p1) }
  0x6d   : > { %1766 = vmatprep.subr.bf16.mxu1 %v2148_v10  ;;  %1760 = vmatprep.mubr.msk.bf16.mxu0 %vm2149_vm0, %v2148_v10 }
  0x6e   : > { %1780 = vmatprep.mubr.msk.bf16.mxu1 %vm2149_vm0, %v2148_v10 }
  0x6f   : > { %1747 = vmatpush3.bf16.msra.mxu0 %v2027_v36  ;;  %v2070_v36 = vld [vmem:[%s2283_s10 + $0x1f0] sm:$0xff]  }
  0x70   : > { %1767 = vmatpush3.bf16.msra.mxu1 %v2028_v37  ;;  %1748 = vmatprep.subr.bf16.mxu0 %v2148_v10  ;;  %v389_v37 = vadd.f32 0.5, %v381_v33  ;;  %v2152_v33 = vmov (!%p1609_p1), 0.0  }
  0x71   : > { %1768 = vmatprep.subr.bf16.mxu1 %v2148_v10 }
  0x73   : > { %1749 = vmatpush3.bf16.msra.mxu0 %v2029_v38  ;;  %v2071_v38 = vld [vmem:[%s2283_s10 + $0x1b8] sm:$0xff]  }
  0x74   : > { %1769 = vmatpush3.bf16.msra.mxu1 %v2030_v39  ;;  %1750 = vmatprep.subr.bf16.mxu0 %v2148_v10  ;;  %v390_v39 = vadd.f32 0.5, %v382_v35  ;;  %v1279_v35 = vld [vmem:[%s2538_s2 + $0x20] sm:$0xff] (!%p1609_p1) }
  0x75   : > { %1770 = vmatprep.subr.bf16.mxu1 %v2148_v10 }
  0x77   : > { %1751 = vmatpush3.bf16.msra.mxu0 %v2031_v40  ;;  %v2072_v40 = vld [vmem:[%s2283_s10 + $0x1f8] sm:$0xff]  }
  0x78   : > { %1771 = vmatpush3.bf16.msra.mxu1 %v2032_v41  ;;  %1752 = vmatprep.subr.bf16.mxu0 %v2148_v10  ;;  %v397_v41 = vpack.c.bf16 %v389_v37, %v389_v37  ;;  %v2153_v37 = vmov (!%p1609_p1), 1966171168  }
  0x79   : > { %1772 = vmatprep.subr.bf16.mxu1 %v2148_v10 }
  0x7b   : > { %1753 = vmatpush3.bf16.msra.mxu0 %v2033_v42  ;;  %v398_v42 = vpack.c.bf16 %v390_v39, %v390_v39  ;;  %v1313_v39 = vlaneseq (!%p1609_p1) }
  0x7c   : > { %1773 = vmatpush3.bf16.msra.mxu1 %v2034_v43  ;;  %1754 = vmatprep.subr.bf16.mxu0 %v2148_v10  ;;  %v399_v43 = vld [vmem:[#allocation2] sm:$0x1] }
  0x7d   : > { %1774 = vmatprep.subr.bf16.mxu1 %v2148_v10 }
  0x7f   : > { %1755 = vmatpush3.bf16.msra.mxu0 %v2035_v44  ;;  %v400_v44 = vld [vmem:[#allocation2 + $0x1] sm:$0x1] }
  0x80   : > { %1775 = vmatpush3.bf16.msra.mxu1 %v2036_v46  ;;  %1756 = vmatprep.subr.bf16.mxu0 %v2148_v10 }
  0x81   : > { %1776 = vmatprep.subr.bf16.mxu1 %v2148_v10 }
  0x83   : > { %1757 = vmatpush3.bf16.msra.mxu0 %v2037_v49 }
  0x84   : > { %1777 = vmatpush3.bf16.msra.mxu1 %v2038_v51  ;;  %1758 = vmatprep.subr.bf16.mxu0 %v2148_v10 }
  0x85   : > { %1778 = vmatprep.subr.bf16.mxu1 %v2148_v10 }
  0x87   : > { %1759 = vmatpush3.bf16.msra.mxu0 %v2039_v53 }
  0x88   : > { %1779 = vmatpush3.bf16.msra.mxu1 %v2040_v55  ;;  %1784 = vmatprep.subr.bf16.mxu0 %v2148_v10  ;;  %v402_v55 = vld [vmem:[#allocation2 + $0x3] sm:$0x1] }
  0x89   : > { %1804 = vmatprep.subr.bf16.mxu1 %v2148_v10 }
  0x8a   : > { %1761 = vmatmul.mubr.bf16.vlgmr.msra.gmra.mrb[4].mxu0 %v393_v56 }
  0x8b   : > { %1781 = vmatmul.mubr.bf16.vlgmr.msra.gmra.mrb[4].mxu1 %v394_v57  ;;  %1785 = vmatpush3.bf16.msra.mxu0 %v2041_v58 }
  0x8c   : > { %1805 = vmatpush3.bf16.msra.mxu1 %v2042_v59  ;;  %1786 = vmatprep.subr.bf16.mxu0 %v2148_v10 }
  0x8d   : > { %1806 = vmatprep.subr.bf16.mxu1 %v2148_v10  ;;  %1800 = vmatprep.mubr.msk.bf16.mxu0 %vm2149_vm0, %v2148_v10 }
  0x8e   : > { %1820 = vmatprep.mubr.msk.bf16.mxu1 %vm2149_vm0, %v2148_v10 }
  0x8f   : > { %1787 = vmatpush3.bf16.msra.mxu0 %v2043_v60 }
  0x90   : > { %1807 = vmatpush3.bf16.msra.mxu1 %v2044_v61  ;;  %1788 = vmatprep.subr.bf16.mxu0 %v2148_v10 }
  0x91   : > { %1808 = vmatprep.subr.bf16.mxu1 %v2148_v10 }
  0x93   : > { %1789 = vmatpush3.bf16.msra.mxu0 %v2045_v62 }
  0x94   : > { %1809 = vmatpush3.bf16.msra.mxu1 %v2046_v63  ;;  %1790 = vmatprep.subr.bf16.mxu0 %v2148_v10 }
  0x95   : > { %1810 = vmatprep.subr.bf16.mxu1 %v2148_v10 }
  0x97   : > { %1791 = vmatpush3.bf16.msra.mxu0 %v2047_v0 }
  0x98   : > { %1811 = vmatpush3.bf16.msra.mxu1 %v2048_v1  ;;  %1792 = vmatprep.subr.bf16.mxu0 %v2148_v10 }
  0x99   : > { %1812 = vmatprep.subr.bf16.mxu1 %v2148_v10 }
  0x9b   : > { %1793 = vmatpush3.bf16.msra.mxu0 %v2049_v2  ;;  %v403_v2 = vld [vmem:[#allocation2 + $0x4] sm:$0x1] }
  0x9c   : > { %1813 = vmatpush3.bf16.msra.mxu1 %v2050_v3  ;;  %1794 = vmatprep.subr.bf16.mxu0 %v2148_v10  ;;  %v404_v3 = vld [vmem:[#allocation2 + $0x5] sm:$0x1] }
  0x9d   : > { %1814 = vmatprep.subr.bf16.mxu1 %v2148_v10 }
  0x9f   : > { %1795 = vmatpush3.bf16.msra.mxu0 %v2051_v4 }
  0xa0   : > { %1815 = vmatpush3.bf16.msra.mxu1 %v2052_v6  ;;  %1796 = vmatprep.subr.bf16.mxu0 %v2148_v10 }
  0xa1   : > { %1816 = vmatprep.subr.bf16.mxu1 %v2148_v10 }
  0xa3   : > { %1797 = vmatpush3.bf16.msra.mxu0 %v2053_v9 }
  0xa4   : > { %1817 = vmatpush3.bf16.msra.mxu1 %v2054_v12  ;;  %1798 = vmatprep.subr.bf16.mxu0 %v2148_v10 }
  0xa5   : > { %1818 = vmatprep.subr.bf16.mxu1 %v2148_v10 }
  0xa7   : > { %1799 = vmatpush3.bf16.msra.mxu0 %v2055_v14 }
  0xa8   : > { %1819 = vmatpush3.bf16.msra.mxu1 %v2056_v16  ;;  %1824 = vmatprep.subr.bf16.mxu0 %v2148_v10  ;;  %v406_v16 = vld [vmem:[#allocation2 + $0x7] sm:$0x1] }
  0xa9   : > { %1844 = vmatprep.subr.bf16.mxu1 %v2148_v10 }
  0xaa   : > { %1801 = vmatmul.mubr.bf16.vlgmr.msra.gmra.mrb[8].mxu0 %v395_v17 }
  0xab   : > { %1821 = vmatmul.mubr.bf16.vlgmr.msra.gmra.mrb[8].mxu1 %v396_v18  ;;  %1825 = vmatpush3.bf16.msra.mxu0 %v2057_v19 }
  0xac   : > { %1845 = vmatpush3.bf16.msra.mxu1 %v2058_v20  ;;  %1826 = vmatprep.subr.bf16.mxu0 %v2148_v10 }
  0xad   : > { %1846 = vmatprep.subr.bf16.mxu1 %v2148_v10  ;;  %1840 = vmatprep.mubr.msk.bf16.mxu0 %vm2149_vm0, %v2148_v10 }
  0xae   : > { %1860 = vmatprep.mubr.msk.bf16.mxu1 %vm2149_vm0, %v2148_v10 }
  0xaf   : > { %1827 = vmatpush3.bf16.msra.mxu0 %v2059_v21 }
  0xb0   : > { %1847 = vmatpush3.bf16.msra.mxu1 %v2060_v22  ;;  %1828 = vmatprep.subr.bf16.mxu0 %v2148_v10 }
  0xb1   : > { %1848 = vmatprep.subr.bf16.mxu1 %v2148_v10 }
  0xb3   : > { %1829 = vmatpush3.bf16.msra.mxu0 %v2061_v23 }
  0xb4   : > { %1849 = vmatpush3.bf16.msra.mxu1 %v2062_v24  ;;  %1830 = vmatprep.subr.bf16.mxu0 %v2148_v10 }
  0xb5   : > { %1850 = vmatprep.subr.bf16.mxu1 %v2148_v10 }
  0xb7   : > { %1831 = vmatpush3.bf16.msra.mxu0 %v2063_v25 }
  0xb8   : > { %1851 = vmatpush3.bf16.msra.mxu1 %v2064_v26  ;;  %1832 = vmatprep.subr.bf16.mxu0 %v2148_v10 }
  0xb9   : > { %1852 = vmatprep.subr.bf16.mxu1 %v2148_v10 }
  0xbb   : > { %1833 = vmatpush3.bf16.msra.mxu0 %v2065_v27  ;;  %v1275_v27 = vld [vmem:[%s2538_s2] sm:$0xff] (!%p1609_p1) }
  0xbc   : > { %1853 = vmatpush3.bf16.msra.mxu1 %v2066_v28  ;;  %1834 = vmatprep.subr.bf16.mxu0 %v2148_v10  ;;  %v1276_v28 = vld [vmem:[%s2538_s2 + $0x8] sm:$0xff] (!%p1609_p1) }
  0xbd   : > { %1854 = vmatprep.subr.bf16.mxu1 %v2148_v10 }
  0xbf   : > { %1835 = vmatpush3.bf16.msra.mxu0 %v2067_v29  ;;  %v1277_v29 = vld [vmem:[%s2538_s2 + $0x10] sm:$0xff] (!%p1609_p1) }
  0xc0   : > { %1855 = vmatpush3.bf16.msra.mxu1 %v2068_v31  ;;  %1836 = vmatprep.subr.bf16.mxu0 %v2148_v10  ;;  %v1900_v31 = vpack.c.bf16 (!%p1609_p1), %v1276_v28, %v1275_v27 }
  0xc1   : > { %1856 = vmatprep.subr.bf16.mxu1 %v2148_v10 }
  0xc3   : > { %1837 = vmatpush3.bf16.msra.mxu0 %v2069_v34  ;;  %v1903_v34 = vpack.c.bf16 (!%p1609_p1), %v1278_v32, %v1277_v29 }
  0xc4   : > { %1857 = vmatpush3.bf16.msra.mxu1 %v2070_v36  ;;  %1838 = vmatprep.subr.bf16.mxu0 %v2148_v10  ;;  %v1280_v36 = vld [vmem:[%s2538_s2 + $0x28] sm:$0xff] (!%p1609_p1) }
  0xc5   : > { %1858 = vmatprep.subr.bf16.mxu1 %v2148_v10 }
  0xc7   : > { %1839 = vmatpush3.bf16.msra.mxu0 %v2071_v38  ;;  %v1311_v38 = vunpack.c.l.s4 (!%p1609_p1), %v2153_v37 }
  0xc8   : > { %1859 = vmatpush3.bf16.msra.mxu1 %v2072_v40  ;;  %1899 = vmatprep.subr.bf16.mxu0 (!%p1609_p1), %v2150_v30 }
  0xca   : > { %1841 = vmatmul.mubr.bf16.vlgmr.msra.gmra.mrb[12].mxu0 %v397_v41 }
  0xcb   : > { %1861 = vmatmul.mubr.bf16.vlgmr.msra.gmra.mrb[12].mxu1 %v398_v42  ;;  %1896 = vmatprep.mubr.msk.f32.mxu0 (!%p1609_p1), %vm2151_vm1, %v2152_v33 }
  0xcc   : > { %1901 = vmatpush3.bf16.msra.mxu0 (!%p1609_p1), %v1900_v31 }
  0xcd   : > { %1902 = vmatprep.subr.bf16.mxu0 (!%p1609_p1), %v2150_v30 }
  0xd0   : > { %1904 = vmatpush3.bf16.msra.mxu0 (!%p1609_p1), %v1903_v34 }
  0xd1   : > { %1905 = vmatprep.subr.bf16.mxu0 (!%p1609_p1), %v2150_v30 }
 0x13d   : > { %v617_v45 = vpop.f32.mrb[0].mxu0 }
 0x13e   : > { %v1239_v46 = vadd.f32 %v617_v45, %v399_v43  ;;  %v705_v47 = vpop.f32.mrb[0].mxu1  ;;  %v1722_v48 = vpop.f32.mrb[1].mxu0  ;;  %v1906_v45 = vpack.c.bf16 (!%p1609_p1), %v1280_v36, %v1279_v35 }
 0x13f   : > { %v1240_v49 = vadd.f32 %v705_v47, %v400_v44  ;;  %v1742_v50 = vpop.f32.mrb[1].mxu1  ;;  %v620_v51 = vpop.f32.mrb[2].mxu0 }
 0x140   : > { %1247 = vst [vmem:[#allocation2] sm:$0x1] %v1239_v46  ;;  %v708_v52 = vpop.f32.mrb[2].mxu1  ;;  %v1723_v53 = vpop.f32.mrb[3].mxu0  ;;  %v1282_v50 = vld [vmem:[%s2538_s2 + $0x38] sm:$0xff] (!%p1609_p1)  ;;  %v1312_v51 = vunpack.c.0.s8 (!%p1609_p1), %v1311_v38  ;;  %1907 = vmatpush3.bf16.msra.mxu0 (!%p1609_p1), %v1906_v45 }
 0x141   : > { %1248 = vst [vmem:[#allocation2 + $0x1] sm:$0x1] %v1240_v49  ;;  %v1743_v10 = vpop.f32.mrb[3].mxu1  ;;  %v1281_v49 = vld [vmem:[%s2538_s2 + $0x30] sm:$0xff] (!%p1609_p1)  ;;  %v1314_v52 = vshrl.u32 (!%p1609_p1), %v1313_v39, 7  ;;  %1908 = vmatprep.subr.bf16.mxu0 (!%p1609_p1), %v2150_v30 }
 0x147   : > { %v1259_v40 = vld [vmem:[#allocation2] sm:$0x1] (!%p1609_p1) }
 0x148   : > { %v1260_v41 = vld [vmem:[#allocation2 + $0x1] sm:$0x1] (!%p1609_p1)  ;;  %v1267_v53 = vmul.f32 (!%p1609_p1), 0.00390625, %v1259_v40 }
 0x149   : > { %v1268_v10 = vmul.f32 (!%p1609_p1), 0.00390625, %v1260_v41 }
 0x15d   : > { %v793_v56 = vpop.f32.mrb[4].mxu0 }
 0x15e   : > { %v1241_v57 = vadd.f32 %v793_v56, %v401_v54  ;;  %v881_v58 = vpop.f32.mrb[4].mxu1  ;;  %v1762_v59 = vpop.f32.mrb[5].mxu0 }
 0x15f   : > { %v1242_v60 = vadd.f32 %v881_v58, %v402_v55  ;;  %v1782_v61 = vpop.f32.mrb[5].mxu1  ;;  %v796_v62 = vpop.f32.mrb[6].mxu0 }
 0x160   : > { %1249 = vst [vmem:[#allocation2 + $0x2] sm:$0x1] %v1241_v57  ;;  %v884_v63 = vpop.f32.mrb[6].mxu1  ;;  %v1763_v0 = vpop.f32.mrb[7].mxu0  ;;  %v1283_v61 = vld [vmem:[%s2538_s2 + $0x40] sm:$0xff] (!%p1609_p1)  ;;  %v1284_v62 = vld [vmem:[%s2538_s2 + $0x48] sm:$0xff] (!%p1609_p1) }
 0x161   : > { %1250 = vst [vmem:[#allocation2 + $0x3] sm:$0x1] %v1242_v60  ;;  %v1783_v1 = vpop.f32.mrb[7].mxu1  ;;  %v1909_v60 = vpack.c.bf16 (!%p1609_p1), %v1282_v50, %v1281_v49  ;;  %v1315_v63 = vsub.s32 (!%p1609_p1), %v1312_v51, %v1314_v52  ;;  %v1306_v0 = vcombine.low (!%p1609_p1), %v1267_v53, %v1268_v10 }
 0x163   : > { %1910 = vmatpush3.bf16.msra.mxu0 (!%p1609_p1), %v1909_v60 }
 0x164   : > { %1911 = vmatprep.subr.bf16.mxu0 (!%p1609_p1), %v2150_v30 }
 0x167   : > { %v1261_v42 = vld [vmem:[#allocation2 + $0x2] sm:$0x1] (!%p1609_p1) }
 0x168   : > { %v1262_v43 = vld [vmem:[#allocation2 + $0x3] sm:$0x1] (!%p1609_p1)  ;;  %v1269_v54 = vmul.f32 (!%p1609_p1), 0.00390625, %v1261_v42 }
 0x169   : > { %v1270_v55 = vmul.f32 (!%p1609_p1), 0.00390625, %v1262_v43 }
 0x16b   : > { %v1307_v1 = vcombine.low (!%p1609_p1), %v1269_v54, %v1270_v55 }
 0x17d   : > { %v969_v4 = vpop.f32.mrb[8].mxu0 }
 0x17e   : > { %v1243_v5 = vadd.f32 %v969_v4, %v403_v2  ;;  %v1057_v6 = vpop.f32.mrb[8].mxu1  ;;  %v1802_v7 = vpop.f32.mrb[9].mxu0  ;;  %v1912_v4 = vpack.c.bf16 (!%p1609_p1), %v1284_v62, %v1283_v61 }
 0x17f   : > { %v1244_v8 = vadd.f32 %v1057_v6, %v404_v3  ;;  %v1822_v9 = vpop.f32.mrb[9].mxu1  ;;  %v972_v11 = vpop.f32.mrb[10].mxu0  ;;  %v1286_v6 = vld [vmem:[%s2538_s2 + $0x58] sm:$0xff] (!%p1609_p1)  ;;  %v1316_v7 = vrot.slane (!%p1609_p1), %v1306_v0, %v1315_v63 }
 0x180   : > { %1251 = vst [vmem:[#allocation2 + $0x4] sm:$0x1] %v1243_v5  ;;  %v1060_v12 = vpop.f32.mrb[10].mxu1  ;;  %v1803_v13 = vpop.f32.mrb[11].mxu0  ;;  %v1285_v5 = vld [vmem:[%s2538_s2 + $0x50] sm:$0xff] (!%p1609_p1)  ;;  %1913 = vmatpush3.bf16.msra.mxu0 (!%p1609_p1), %v1912_v4 }
 0x181   : > { %1252 = vst [vmem:[#allocation2 + $0x5] sm:$0x1] %v1244_v8  ;;  %v1823_v14 = vpop.f32.mrb[11].mxu1  ;;  %v1323_v8 = vrot.slane (!%p1609_p1), %v1307_v1, %v1315_v63  ;;  %v1915_v12 = vpack.c.bf16 (!%p1609_p1), %v1286_v6, %v1285_v5  ;;  %1914 = vmatprep.subr.bf16.mxu0 (!%p1609_p1), %v2150_v30  ;;  %v1287_v13 = vld [vmem:[%s2538_s2 + $0x60] sm:$0xff] (!%p1609_p1) }
 0x182   : > { %v1288_v14 = vld [vmem:[%s2538_s2 + $0x68] sm:$0xff] (!%p1609_p1) }
 0x184   : > { %1916 = vmatpush3.bf16.msra.mxu0 (!%p1609_p1), %v1915_v12 }
 0x185   : > { %1917 = vmatprep.subr.bf16.mxu0 (!%p1609_p1), %v2150_v30 }
 0x187   : > { %v1263_v44 = vld [vmem:[#allocation2 + $0x4] sm:$0x1] (!%p1609_p1) }
 0x188   : > { %v1264_v46 = vld [vmem:[#allocation2 + $0x5] sm:$0x1] (!%p1609_p1)  ;;  %v1271_v56 = vmul.f32 (!%p1609_p1), 0.00390625, %v1263_v44 }
 0x189   : > { %v1272_v57 = vmul.f32 (!%p1609_p1), 0.00390625, %v1264_v46 }
 0x18b   : > { %v1308_v2 = vcombine.low (!%p1609_p1), %v1271_v56, %v1272_v57 }
 0x18d   : > { %v1330_v9 = vrot.slane (!%p1609_p1), %v1308_v2, %v1315_v63 }
 0x19b   : > { %1258 = sbr.rel (%p1609_p1) target bundleno = 652 (0x28c), region = 89 }
 0x19d   : > { %v1145_v17 = vpop.f32.mrb[12].mxu0 }
 0x19e   : > { %v1245_v18 = vadd.f32 %v1145_v17, %v405_v15  ;;  %v1233_v19 = vpop.f32.mrb[12].mxu1  ;;  %v1842_v20 = vpop.f32.mrb[13].mxu0  ;;  %v1338_v15 = vcombine.low (!%p1609_p1), %v1316_v7, %v1323_v8  ;;  %v1918_v17 = vpack.c.bf16 (!%p1609_p1), %v1288_v14, %v1287_v13 }
 0x19f   : > { %v1246_v21 = vadd.f32 %v1233_v19, %v406_v16  ;;  %v1862_v22 = vpop.f32.mrb[13].mxu1  ;;  %v1148_v23 = vpop.f32.mrb[14].mxu0  ;;  %v1290_v19 = vld [vmem:[%s2538_s2 + $0x78] sm:$0xff] (!%p1609_p1) }
 0x1a0   : > { %1253 = vst [vmem:[#allocation2 + $0x6] sm:$0x1] %v1245_v18  ;;  %v1236_v24 = vpop.f32.mrb[14].mxu1  ;;  %v1843_v25 = vpop.f32.mrb[15].mxu0  ;;  %v1289_v18 = vld [vmem:[%s2538_s2 + $0x70] sm:$0xff] (!%p1609_p1)  ;;  %v1346_v20 = vrot.slane (!%p1609_p1), %v1338_v15, %v1315_v63  ;;  %1919 = vmatpush3.bf16.msra.mxu0 (!%p1609_p1), %v1918_v17 }
 0x1a1   : > { %1254 = vst [vmem:[#allocation2 + $0x7] sm:$0x1] %v1246_v21  ;;  %v1863_v26 = vpop.f32.mrb[15].mxu1  ;;  %v1921_v22 = vpack.c.bf16 (!%p1609_p1), %v1290_v19, %v1289_v18  ;;  %1920 = vmatprep.subr.bf16.mxu0 (!%p1609_p1), %v2150_v30  ;;  %v1610_v24 = vld [vmem:[%s2539_s3] ss:$0 sm:$0xff] (!%p1609_p1) }
 0x1a4   : > { %1922 = vmatpush3.bf16.msra.mxu0 %v1921_v22 }
 0x1a7   : > { %v1265_v47 = vld [vmem:[#allocation2 + $0x6] sm:$0x1] }
 0x1a8   : > { %v1266_v48 = vld [vmem:[#allocation2 + $0x7] sm:$0x1]  ;;  %v1273_v58 = vmul.f32 0.00390625, %v1265_v47 }
 0x1a9   : > { %v1274_v59 = vmul.f32 0.00390625, %v1266_v48 }
 0x1ab   : > { %v1309_v3 = vcombine.low %v1273_v58, %v1274_v59 }
 0x1ad   : > { %v1337_v11 = vrot.slane %v1309_v3, %v1315_v63 }
 0x1af   : > { %v1339_v16 = vcombine.low %v1330_v9, %v1337_v11 }
 0x1b1   : > { %v1353_v21 = vrot.slane %v1339_v16, %v1315_v63 }
 0x1b3   : > { %v1354_v23 = vcombine.low %v1346_v20, %v1353_v21 }
 0x1b5   : > { %1897 = vmatmul.mubr.f32.vlgmr.msra.gmra.mrb[0].mxu0 %v1354_v23 }
 0x288   : > { %v1422_v25 = vpop.f32.mrb[0].mxu0 }
 0x289   : > { %v1423_v26 = vadd.f32 %v1610_v24, %v1422_v25  ;;  %v1898_v27 = vpop.f32.mrb[1].mxu0 }
 0x28b   : > { %1427 = vst.msk [vmem:[%s2294_s25] sm:$0xff] %vm1426_vm2, %v1423_v26 }
 0x28c PF: > { %s17_s22 = sadd.s32 1, %s2139_s22   ;;  %s2545_s15 = smov %s2115_s16 }
 0x28d   : > { %p14_p2 = scmp.ge.s32.totalorder %s17_s22, 6   ;;  %s2546_s16 = smov %s2119_s17 }
 0x28e   : > { %s2547_s17 = smov %s2243_s6  ;;  %s2548_s18 = smov %s2131_s20 }
 0x28f   : > { %s2549_s19 = smov %s2135_s21  ;;  %s2550_s20 = smov %s2553_s23 }
 0x290   : > { %s2551_s21 = smov %s2557_s24  ;;  %16 = sbr.rel (!%p14_p2) target bundleno = 7 (0x7), region = 138 }
 0x297   :  { %1447 = vsyncpa [#allocation4], 1 }
 0x298   :  { %1449 = vsyncpa [#allocation4 + $0x1], 1 }

</bundles_post_ra>
